<compile_context>
chip_gen: v6e
topology: v6e:2x2x1
jax: 0.10.0
libtpu: 0.0.40
codegen_flags: <defaults>
</compile_context>

<pallas_src>
import jax
import jax.numpy as jnp
from jax.experimental import pallas as pl
from jax.experimental.pallas import tpu as pltpu


def _round_up(x, m):
    return (x + m - 1) // m * m


def _qnet_kernel(obs_ref, w1_ref, b1_ref, w2_ref, b2_ref, w3_ref, b3_ref,
                 logits_ref):
    """Fused 3-layer MLP Q-network on one (TB, D_pad) batch tile.

    Weights/activations are bf16 on the MXU, accumulation in f32, biases f32.
    Weight refs use constant index_maps + single buffering -> VMEM-resident.
    """
    x = obs_ref[...]                                              # (TB, D_pad) bf16
    h1 = jnp.dot(x, w1_ref[...], preferred_element_type=jnp.float32) + b1_ref[...]
    h1 = jnp.maximum(h1, 0.0).astype(jnp.bfloat16)
    h2 = jnp.dot(h1, w2_ref[...], preferred_element_type=jnp.float32) + b2_ref[...]
    h2 = jnp.maximum(h2, 0.0).astype(jnp.bfloat16)
    logits = jnp.dot(h2, w3_ref[...], preferred_element_type=jnp.float32) + b3_ref[...]
    logits_ref[...] = logits                                      # (TB, A_pad) f32, lane-dense


def _pick_batch_tile(B, D_pad, H_pad, A_pad, weight_bytes):
    """Pick the batch tile TB (multiple of 16) and the VMEM limit to request."""
    TB_CAP = 1024                       # 512-1024 row tiles ~ 85% of HBM roofline
    VMEM_BUDGET = 40 << 20              # v7x-safe buffer budget (64 MiB physical)

    B16 = _round_up(B, 16)
    if B16 <= 16:
        tb = 16                                          # tiny batch: one step
    elif B16 <= 2 * TB_CAP:
        tb = _round_up(pl.cdiv(B16, 2), 16)              # >=2 steps (v7x dual-TC)
    else:
        tb = TB_CAP

    def buf_bytes(t):
        return (2 * t * D_pad * 2        # obs tile, double-buffered, bf16
                + 2 * t * A_pad * 4      # logits tile, double-buffered, f32
                + weight_bytes)          # weights/biases, single-buffered

    while tb > 16 and buf_bytes(tb) > VMEM_BUDGET:
        tb -= 16

    # Scoped-VMEM request: pipeline buffers + room for h1/h2 intermediates.
    vmem_need = buf_bytes(tb) + 6 * tb * H_pad * 4 + (2 << 20)
    vmem_limit = int(min(max(vmem_need, 32 << 20), 56 << 20))
    return tb, vmem_limit


def qnet_forward(obs_flat, pparams, n_actions):
    """Run the fused Q-network Pallas kernel.

    obs_flat: (B, D) float32
    pparams: lane-padded params (weights bf16, biases f32):
      w1 (D_pad, H_pad), b1 (1, H_pad), w2 (H_pad, H_pad), b2 (1, H_pad),
      w3 (H_pad, A_pad), b3 (1, A_pad)
    returns: logits (B, n_actions) float32, act (B,) int32
    """
    B, D = obs_flat.shape
    D_pad, H_pad = pparams["w1"].shape
    A_pad = pparams["w3"].shape[1]

    weight_bytes = (
        (pparams["w1"].size + pparams["w2"].size + pparams["w3"].size) * 2
        + (pparams["b1"].size + pparams["b2"].size + pparams["b3"].size) * 4)

    TB, vmem_limit = _pick_batch_tile(B, D_pad, H_pad, A_pad, weight_bytes)
    B_pad = _round_up(B, TB)

    # Cast once; pad only if needed (jnp.pad fuses — no materialized second copy
    # of obs in HBM, unlike zeros().at[].set()).
    obs = obs_flat.astype(jnp.bfloat16)
    if B_pad != B or D_pad != D:
        obs = jnp.pad(obs, ((0, B_pad - B), (0, D_pad - D)))

    grid = (B_pad // TB,)

    # Weights/biases: constant index_map + single buffer -> VMEM-resident,
    # no wasted double-buffer VMEM.
    def const(shape):
        return pl.BlockSpec(shape, lambda i: (0, 0), pipeline_mode=pl.Buffered(1))

    flops = 2 * B_pad * (D_pad * H_pad + H_pad * H_pad + H_pad * A_pad)
    bytes_accessed = (B_pad * D_pad * 2 + weight_bytes + B_pad * A_pad * 4)

    logits_pad = pl.pallas_call(
        _qnet_kernel,
        out_shape=jax.ShapeDtypeStruct((B_pad, A_pad), jnp.float32),
        grid=grid,
        in_specs=[
            pl.BlockSpec((TB, D_pad), lambda i: (i, 0)),          # obs: tiled over batch
            const((D_pad, H_pad)), const((1, H_pad)),              # w1, b1
            const((H_pad, H_pad)), const((1, H_pad)),              # w2, b2
            const((H_pad, A_pad)), const((1, A_pad)),              # w3, b3
        ],
        out_specs=pl.BlockSpec((TB, A_pad), lambda i: (i, 0)),     # lane-dense logits
        compiler_params=pltpu.CompilerParams(
            dimension_semantics=("parallel",),
            vmem_limit_bytes=vmem_limit,
        ),
        cost_estimate=pl.CostEstimate(
            flops=flops, transcendentals=0, bytes_accessed=bytes_accessed),
    )(obs, pparams["w1"], pparams["b1"], pparams["w2"], pparams["b2"],
      pparams["w3"], pparams["b3"])

    logits = logits_pad[:B, :n_actions]
    act = jnp.argmax(logits, axis=-1).astype(jnp.int32)
    return logits, act


def policy_forward(obs_nchw, pparams, n_actions, epsilon, key):
    """Mirrors Policy.forward: vals = algo_policy(batch); vals.sampled_act =
    exploration_noise(vals.act, batch)  (epsilon-greedy for discrete actions)."""
    B = obs_nchw.shape[0]
    obs_flat = obs_nchw.reshape(B, -1).astype(jnp.float32)   # flatten NCHW -> (B, D)

    logits, act = qnet_forward(obs_flat, pparams, n_actions)

    # Epsilon-greedy exploration noise — stochastic glue, not the hot path.
    k1, k2 = jax.random.split(key)
    rand_act = jax.random.randint(k1, (B,), 0, n_actions, dtype=jnp.int32)
    explore = jax.random.uniform(k2, (B,)) < epsilon
    sampled_act = jnp.where(explore, rand_act, act)
    return {"logits": logits, "act": act, "sampled_act": sampled_act}


def init_params(key, in_dim, hidden, n_actions):
    """Deterministic synthetic init (stands in for init_networks/reset_params)."""
    ks = jax.random.split(key, 3)

    def linear(k, d_in, d_out):
        scale = 1.0 / jnp.sqrt(jnp.float32(d_in))
        w = jax.random.uniform(k, (d_in, d_out), jnp.float32, -scale, scale)
        b = jnp.zeros((1, d_out), jnp.float32)
        return w, b

    w1, b1 = linear(ks[0], in_dim, hidden)
    w2, b2 = linear(ks[1], hidden, hidden)
    w3, b3 = linear(ks[2], hidden, n_actions)
    return {"w1": w1, "b1": b1, "w2": w2, "b2": b2, "w3": w3, "b3": b3}


def pad_and_cast_params(params):
    """Zero-pad every dim to a multiple of 128 lanes; weights -> bf16, biases f32.

    Note: 128 lanes only — no extra padding to 'fill' the 256-wide MXU; the
    kernel is memory-bound so larger padding just doubles weight DMA/VMEM."""
    def pad2(a, rows, cols, dtype):
        out = jnp.zeros((rows, cols), dtype)
        return out.at[:a.shape[0], :a.shape[1]].set(a.astype(dtype))

    D, H = params["w1"].shape
    A = params["w3"].shape[1]
    D_pad, H_pad, A_pad = _round_up(D, 128), _round_up(H, 128), _round_up(A, 128)
    return {
        "w1": pad2(params["w1"], D_pad, H_pad, jnp.bfloat16),
        "b1": pad2(params["b1"], 1, H_pad, jnp.float32),
        "w2": pad2(params["w2"], H_pad, H_pad, jnp.bfloat16),
        "b2": pad2(params["b2"], 1, H_pad, jnp.float32),
        "w3": pad2(params["w3"], H_pad, A_pad, jnp.bfloat16),
        "b3": pad2(params["b3"], 1, A_pad, jnp.float32),
    }


if __name__ == "__main__":
    key = jax.random.PRNGKey(0)
    k_obs, k_par, k_noise = jax.random.split(key, 3)

    # Small shapes consistent with the module: image-like obs (NCHW) flattened
    # into the Q-network, discrete action space.
    B, C, Hh, Ww = 2, 4, 8, 8          # obs input_shape
    in_dim = C * Hh * Ww               # 256
    hidden = 32
    n_actions = 8
    epsilon = 0.1

    obs = jax.random.normal(k_obs, (B, C, Hh, Ww), dtype=jnp.float32)
    params = init_params(k_par, in_dim, hidden, n_actions)
    pparams = pad_and_cast_params(params)

    out = policy_forward(obs, pparams, n_actions, epsilon, k_noise)
    jax.block_until_ready(out)

    # Reference check (plain JAX, same bf16-operand / f32-accumulate regime).
    x = obs.reshape(B, -1).astype(jnp.bfloat16)
    w1b = params["w1"].astype(jnp.bfloat16)
    w2b = params["w2"].astype(jnp.bfloat16)
    w3b = params["w3"].astype(jnp.bfloat16)
    h1 = jnp.maximum(jnp.dot(x, w1b, preferred_element_type=jnp.float32)
                     + params["b1"], 0.0).astype(jnp.bfloat16)
    h2 = jnp.maximum(jnp.dot(h1, w2b, preferred_element_type=jnp.float32)
                     + params["b2"], 0.0).astype(jnp.bfloat16)
    ref_logits = jnp.dot(h2, w3b, preferred_element_type=jnp.float32) + params["b3"]

    assert out["logits"].shape == (B, n_actions)
    assert jnp.allclose(out["logits"], ref_logits, atol=1e-3, rtol=1e-3), (
        float(jnp.max(jnp.abs(out["logits"] - ref_logits))))
    assert jnp.array_equal(out["act"],
                           jnp.argmax(out["logits"], axis=-1).astype(jnp.int32))
    assert out["sampled_act"].shape == (B,)

    # TODO(synk): replay-buffer sampling / HER merging / optimizer update paths
    # (Policy.update / sample_indices / update_epsilon bookkeeping) are host-side
    # control flow with no Pallas equivalent; only the forward + exploration-noise
    # path is kernelized.
    print("KERNEL_OK")
</pallas_src>

<mosaic_0001>
module attributes {stable_mosaic.version = 11 : i64} {
  func.func @_qnet_kernel(%arg0: i32, %arg1: memref<16x256xbf16, #tpu.memory_space<vmem>>, %arg2: memref<256x128xbf16, #tpu.memory_space<vmem>>, %arg3: memref<1x128xf32, #tpu.memory_space<vmem>>, %arg4: memref<128x128xbf16, #tpu.memory_space<vmem>>, %arg5: memref<1x128xf32, #tpu.memory_space<vmem>>, %arg6: memref<128x128xbf16, #tpu.memory_space<vmem>>, %arg7: memref<1x128xf32, #tpu.memory_space<vmem>>, %arg8: memref<16x128xf32, #tpu.memory_space<vmem>>) attributes {dimension_semantics = [#tpu.dimension_semantics<parallel>], iteration_bounds = array<i64: 1>, scalar_prefetch = 0 : i64, scratch_operands = 0 : i64, tpu.core_type = #tpu.core_type<tc>, window_params = [{transform_indices = @transform_0, window_bounds = array<i64: 16, 256>}, {pipeline_mode = #tpu.pipeline_mode<synchronous>, transform_indices = @transform_1, window_bounds = array<i64: 256, 128>}, {pipeline_mode = #tpu.pipeline_mode<synchronous>, transform_indices = @transform_2, window_bounds = array<i64: 1, 128>}, {pipeline_mode = #tpu.pipeline_mode<synchronous>, transform_indices = @transform_3, window_bounds = array<i64: 128, 128>}, {pipeline_mode = #tpu.pipeline_mode<synchronous>, transform_indices = @transform_4, window_bounds = array<i64: 1, 128>}, {pipeline_mode = #tpu.pipeline_mode<synchronous>, transform_indices = @transform_5, window_bounds = array<i64: 128, 128>}, {pipeline_mode = #tpu.pipeline_mode<synchronous>, transform_indices = @transform_6, window_bounds = array<i64: 1, 128>}, {transform_indices = @transform_7, window_bounds = array<i64: 16, 128>}]} {
    %c0 = arith.constant 0 : index
    %c0_0 = arith.constant 0 : index
    %0 = vector.load %arg1[%c0, %c0_0] : memref<16x256xbf16, #tpu.memory_space<vmem>>, vector<16x256xbf16>
    %c0_1 = arith.constant 0 : index
    %c0_2 = arith.constant 0 : index
    %1 = vector.load %arg2[%c0_1, %c0_2] : memref<256x128xbf16, #tpu.memory_space<vmem>>, vector<256x128xbf16>
    %cst = arith.constant dense<0.000000e+00> : vector<16x128xf32>
    %2 = tpu.matmul %0, %1, %cst {dimension_numbers = #tpu.dot_dimension_numbers<[1], [0], [0], [1], [0, 0, 1, 1], [], []>} : vector<16x256xbf16>, vector<256x128xbf16>, vector<16x128xf32> -> vector<16x128xf32>
    %c0_3 = arith.constant 0 : index
    %c0_4 = arith.constant 0 : index
    %3 = vector.load %arg3[%c0_3, %c0_4] : memref<1x128xf32, #tpu.memory_space<vmem>>, vector<1x128xf32>
    %4 = vector.broadcast %3 : vector<1x128xf32> to vector<16x128xf32>
    %5 = arith.addf %2, %4 : vector<16x128xf32>
    %cst_5 = arith.constant 0.000000e+00 : f32
    %6 = vector.broadcast %cst_5 : f32 to vector<16x128xf32>
    %7 = arith.maximumf %5, %6 : vector<16x128xf32>
    %8 = arith.truncf %7 : vector<16x128xf32> to vector<16x128xbf16>
    %c0_6 = arith.constant 0 : index
    %c0_7 = arith.constant 0 : index
    %9 = vector.load %arg4[%c0_6, %c0_7] : memref<128x128xbf16, #tpu.memory_space<vmem>>, vector<128x128xbf16>
    %cst_8 = arith.constant dense<0.000000e+00> : vector<16x128xf32>
    %10 = tpu.matmul %8, %9, %cst_8 {dimension_numbers = #tpu.dot_dimension_numbers<[1], [0], [0], [1], [0, 0, 1, 1], [], []>} : vector<16x128xbf16>, vector<128x128xbf16>, vector<16x128xf32> -> vector<16x128xf32>
    %c0_9 = arith.constant 0 : index
    %c0_10 = arith.constant 0 : index
    %11 = vector.load %arg5[%c0_9, %c0_10] : memref<1x128xf32, #tpu.memory_space<vmem>>, vector<1x128xf32>
    %12 = vector.broadcast %11 : vector<1x128xf32> to vector<16x128xf32>
    %13 = arith.addf %10, %12 : vector<16x128xf32>
    %cst_11 = arith.constant 0.000000e+00 : f32
    %14 = vector.broadcast %cst_11 : f32 to vector<16x128xf32>
    %15 = arith.maximumf %13, %14 : vector<16x128xf32>
    %16 = arith.truncf %15 : vector<16x128xf32> to vector<16x128xbf16>
    %c0_12 = arith.constant 0 : index
    %c0_13 = arith.constant 0 : index
    %17 = vector.load %arg6[%c0_12, %c0_13] : memref<128x128xbf16, #tpu.memory_space<vmem>>, vector<128x128xbf16>
    %cst_14 = arith.constant dense<0.000000e+00> : vector<16x128xf32>
    %18 = tpu.matmul %16, %17, %cst_14 {dimension_numbers = #tpu.dot_dimension_numbers<[1], [0], [0], [1], [0, 0, 1, 1], [], []>} : vector<16x128xbf16>, vector<128x128xbf16>, vector<16x128xf32> -> vector<16x128xf32>
    %c0_15 = arith.constant 0 : index
    %c0_16 = arith.constant 0 : index
    %19 = vector.load %arg7[%c0_15, %c0_16] : memref<1x128xf32, #tpu.memory_space<vmem>>, vector<1x128xf32>
    %20 = vector.broadcast %19 : vector<1x128xf32> to vector<16x128xf32>
    %21 = arith.addf %18, %20 : vector<16x128xf32>
    %c0_17 = arith.constant 0 : index
    %c0_18 = arith.constant 0 : index
    %22 = vector.load %arg8[%c0_17, %c0_18] : memref<16x128xf32, #tpu.memory_space<vmem>>, vector<16x128xf32>
    tpu.vector_store %arg8[%c0_17, %c0_18], %21 {strides = array<i32>} : memref<16x128xf32, #tpu.memory_space<vmem>>, vector<16x128xf32>,
    return
  }
  func.func @transform_0(%arg0: i32) -> (i32, i32) {
    %c0_i32 = arith.constant 0 : i32
    %c0_i32_0 = arith.constant 0 : i32
    return %arg0, %c0_i32 : i32, i32
  }
  func.func @transform_1(%arg0: i32) -> (i32, i32) {
    %c0_i32 = arith.constant 0 : i32
    %c0_i32_0 = arith.constant 0 : i32
    %c0_i32_1 = arith.constant 0 : i32
    return %c0_i32, %c0_i32_0 : i32, i32
  }
  func.func @transform_2(%arg0: i32) -> (i32, i32) {
    %c0_i32 = arith.constant 0 : i32
    %c0_i32_0 = arith.constant 0 : i32
    %c0_i32_1 = arith.constant 0 : i32
    return %c0_i32, %c0_i32_0 : i32, i32
  }
  func.func @transform_3(%arg0: i32) -> (i32, i32) {
    %c0_i32 = arith.constant 0 : i32
    %c0_i32_0 = arith.constant 0 : i32
    %c0_i32_1 = arith.constant 0 : i32
    return %c0_i32, %c0_i32_0 : i32, i32
  }
  func.func @transform_4(%arg0: i32) -> (i32, i32) {
    %c0_i32 = arith.constant 0 : i32
    %c0_i32_0 = arith.constant 0 : i32
    %c0_i32_1 = arith.constant 0 : i32
    return %c0_i32, %c0_i32_0 : i32, i32
  }
  func.func @transform_5(%arg0: i32) -> (i32, i32) {
    %c0_i32 = arith.constant 0 : i32
    %c0_i32_0 = arith.constant 0 : i32
    %c0_i32_1 = arith.constant 0 : i32
    return %c0_i32, %c0_i32_0 : i32, i32
  }
  func.func @transform_6(%arg0: i32) -> (i32, i32) {
    %c0_i32 = arith.constant 0 : i32
    %c0_i32_0 = arith.constant 0 : i32
    %c0_i32_1 = arith.constant 0 : i32
    return %c0_i32, %c0_i32_0 : i32, i32
  }
  func.func @transform_7(%arg0: i32) -> (i32, i32) {
    %c0_i32 = arith.constant 0 : i32
    %c0_i32_0 = arith.constant 0 : i32
    return %arg0, %c0_i32 : i32, i32
  }
}

</mosaic_0001>

<bundles_post_ra>
// kernel: tpu_custom_call.1
= control target key start
LH: loop header
LB: loop body
LE: loop exit
PB: predicated region body
PF: predicated region fallthrough
CT: control target
= control target key end

     0   :  { %12 = vsyncpa [#allocation3], 0  ;;  %s901_s0 = inlined_call_operand.hbm [shape: bf16[16,256], index: 0, kind: input, shape index: {}]   ;;  %s902_s1 = inlined_call_operand.hbm [shape: bf16[256,128], index: 1, kind: input, shape index: {}]   ;;  %s903_s2 = inlined_call_operand.vmem [shape: f32[1,128], index: 2, kind: input, shape index: {}]   ;;  %s904_s3 = inlined_call_operand.hbm [shape: bf16[128,128], index: 3, kind: input, shape index: {}]   ;;  %s905_s4 = inlined_call_operand.vmem [shape: f32[1,128], index: 4, kind: input, shape index: {}]   ;;  %s906_s5 = inlined_call_operand.hbm [shape: bf16[128,128], index: 5, kind: input, shape index: {}]   ;;  %s907_s6 = inlined_call_operand.vmem [shape: f32[1,128], index: 6, kind: input, shape index: {}]   ;;  %s908_s7 = inlined_call_operand.hbm [shape: f32[16,128], index: 7, kind: output, shape index: {}]  }
   0x1   :  { %13 = vsyncpa [#allocation6], 0 }
   0x2   :  { %14 = vsyncpa [#allocation9], 0 }
   0x3   :  { %15 = vsyncpa [#allocation4], 0  ;;  %s793_s24 = smov [#allocation5]  }
   0x4   :  { %s33_s25 = sshll.u32 %s793_s24, 4  ;;  %s34_s25 = int_to_ptr.vmem [resolvable:$true] %s33_s25 }
   0x5   :  { %s693_s26 = scalar_lea.vmem %s34_s25, 2048  ;;  %p698_p1 = scmp.lt.s32.totalorder %s34_s25, %s34_s25 }
   0x6   :  { %p694_p0 = scmp.ne.s32.totalorder %s34_s25, %s693_s26  ;;  %p699_p2 = scmp.lt.s32.totalorder %s693_s26, %s693_s26 }
   0x8   :  { %p700_p3 = por %p699_p2, %p698_p1 }
   0xa   :  { %p701_p4 = pnand %p700_p3, %p694_p0 }
   0xc   :  { %704 = shalt.err (!%p701_p4)
}
   0xd   :  { %s794_s27 = smov 64   ;;  %s795_s28 = smov 4  }
   0xe   :  { %39 = dma.hbm_to_vmem [thread:$0]  %s902_s1, 2048, %s34_s25, [#allocation6], %s794_s27, %s794_s27, %s795_s28  }
   0xf   :  { %s796_s8 = smov [#allocation2]  }
  0x10   :  { %s21_s9 = sshll.u32 %s796_s8, 4  ;;  %s22_s9 = int_to_ptr.vmem [resolvable:$true] %s21_s9 }
  0x11   :  { %s713_s10 = scalar_lea.vmem %s22_s9, 256  ;;  %p718_p6 = scmp.lt.s32.totalorder %s22_s9, %s22_s9 }
  0x12   :  { %p714_p5 = scmp.ne.s32.totalorder %s22_s9, %s713_s10  ;;  %p719_p7 = scmp.lt.s32.totalorder %s713_s10, %s713_s10 }
  0x14   :  { %p720_p8 = por %p719_p7, %p718_p6 }
  0x16   :  { %p721_p9 = pnand %p720_p8, %p714_p5 }
  0x18   :  { %724 = shalt.err (!%p721_p9)
}
  0x19   :  { %s797_s11 = smov 128   ;;  %s798_s12 = smov 8  }
  0x1a   :  { %27 = dma.hbm_to_vmem [thread:$0]  %s901_s0, 256, %s22_s9, [#allocation3], %s797_s11, %s797_s11, %s798_s12  }
  0x1b   :  { %s799_s1 = smov [#allocation7]   ;;  %s800_s16 = smov [#allocation8]  }
  0x1c   :  { %s47_s15 = sshll.u32 %s799_s1, 4  ;;  %s61_s17 = sshll.u32 %s800_s16, 4  ;;  %s48_s15 = int_to_ptr.vmem [resolvable:$true] %s47_s15  ;;  %s62_s17 = int_to_ptr.vmem [resolvable:$true] %s61_s17 }
  0x1d   :  { %s733_s18 = scalar_lea.vmem %s48_s15, 1024  ;;  %p738_p11 = scmp.lt.s32.totalorder %s48_s15, %s48_s15 }
  0x1e   :  { %p734_p10 = scmp.ne.s32.totalorder %s48_s15, %s733_s18  ;;  %p739_p12 = scmp.lt.s32.totalorder %s733_s18, %s733_s18 }
  0x20   :  { %p740_p13 = por %p739_p12, %p738_p11 }
  0x22   :  { %p741_p0 = pnand %p740_p13, %p734_p10 }
  0x24   :  { %744 = shalt.err (!%p741_p0)
}
  0x25   :  { %53 = dma.hbm_to_vmem [thread:$0]  %s904_s3, 1024, %s48_s15, [#allocation6], %s794_s27, %s794_s27, %s795_s28  }
  0x26   :  { %s753_s0 = scalar_lea.vmem %s62_s17, 1024  ;;  %p758_p2 = scmp.lt.s32.totalorder %s62_s17, %s62_s17 }
  0x27   :  { %p754_p1 = scmp.ne.s32.totalorder %s62_s17, %s753_s0  ;;  %p759_p3 = scmp.lt.s32.totalorder %s753_s0, %s753_s0 }
  0x29   :  { %p760_p4 = por %p759_p3, %p758_p2 }
  0x2b   :  { %p761_p5 = pnand %p760_p4, %p754_p1 }
  0x2d   :  { %764 = shalt.err (!%p761_p5)
}
  0x2e   :  { %67 = dma.hbm_to_vmem [thread:$0]  %s906_s5, 1024, %s62_s17, [#allocation9], %s794_s27, %s794_s27, %s795_s28  }
  0x2f   :  { %785 = dma.done.wait [#allocation3], 256  }
  0x30   :  { %786 = vsyncadd [#allocation3], 4294967040 }
  0x31   :  { %787 = dma.done.wait [#allocation6], 3072  }
  0x32   :  { %788 = vsyncadd [#allocation6], 4294964224 }
  0x33   :  { %789 = dma.done.wait [#allocation9], 1024  }
  0x34   :  { %790 = vsyncadd [#allocation9], 4294966272  ;;  %v801_v0 = vmov 0.0   ;;  %v650_v1 = vld [vmem:[#allocation5 + $0x78] sm:$0xff]   ;;  %v652_v3 = vld [vmem:[#allocation5 + $0x70] sm:$0xff]   ;;  %vm802_vm0 = vmmov 0  }
  0x35   :  { %599 = vmatprep.subr.bf16.mxu1 %v801_v0  ;;  %v651_v2 = vld [vmem:[#allocation5 + $0x38] sm:$0xff]   ;;  %559 = vmatprep.subr.bf16.mxu0 %v650_v1  ;;  %v653_v4 = vld [vmem:[#allocation5 + $0x30] sm:$0xff]   ;;  %v654_v5 = vld [vmem:[#allocation5 + $0x68] sm:$0xff]   ;;  %s803_s26 = smov [#allocation10]  }
  0x36   :  { %560 = vmatpush3.bf16.msra.mxu0 %v651_v2  ;;  %v655_v6 = vld [vmem:[#allocation5 + $0x28] sm:$0xff]   ;;  %v656_v7 = vld [vmem:[#allocation5 + $0x60] sm:$0xff]   ;;  %v658_v9 = vld [vmem:[#allocation5 + $0x58] sm:$0xff]   ;;  %615 = vmatprep.mubr.msk.bf16.mxu1 %vm802_vm0, %v801_v0  ;;  %s508_s27 = sshll.u32 %s803_s26, 4  ;;  %s509_s27 = int_to_ptr.vmem [resolvable:$true] %s508_s27 }
  0x37   :  { %561 = vmatprep.subr.bf16.mxu0 %v652_v3  ;;  %v657_v8 = vld [vmem:[#allocation5 + $0x20] sm:$0xff]   ;;  %v659_v10 = vld [vmem:[#allocation5 + $0x18] sm:$0xff]   ;;  %v660_v11 = vld [vmem:[#allocation5 + $0x50] sm:$0xff]   ;;  %p770_p7 = scmp.lt.s32.totalorder %s509_s27, %s509_s27 }
  0x38   :  { %v661_v12 = vld [vmem:[#allocation5 + $0x10] sm:$0xff]   ;;  %v669_v14 = vld [vmem:[#allocation7 + $0x38] sm:$0xff]   ;;  %v662_v15 = vld [vmem:[#allocation5 + $0x48] sm:$0xff]  }
  0x39   :  { %v668_v13 = vld [vmem:[#allocation2 + $0x4] ss:$8 sps:$4 sm:$0xff]   ;;  %600 = vmatpush3.bf16.msra.mxu1 %v669_v14  ;;  %v663_v17 = vld [vmem:[#allocation5 + $0x8] sm:$0xff]   ;;  %v664_v18 = vld [vmem:[#allocation5 + $0x40] sm:$0xff]  }
  0x3a   :  { %562 = vmatpush3.bf16.msra.mxu0 %v653_v4  ;;  %262 = vmatprep.mubr.bf16.mxu0 %v668_v13  ;;  %v670_v16 = vld [vmem:[#allocation7 + $0x30] sm:$0xff]   ;;  %v671_v19 = vld [vmem:[#allocation7 + $0x28] sm:$0xff]   ;;  %v665_v20 = vld [vmem:[#allocation5] sm:$0xff]  }
  0x3b   :  { %563 = vmatprep.subr.bf16.mxu0 %v654_v5  ;;  %601 = vmatprep.subr.bf16.mxu1 %v801_v0  ;;  %v672_v21 = vld [vmem:[#allocation7 + $0x20] sm:$0xff]   ;;  %v666_v22 = vld [vmem:[#allocation2] ss:$8 sps:$4 sm:$0xff]   ;;  %v675_v25 = vld [vmem:[#allocation7 + $0x8] sm:$0xff]  }
  0x3c   :  { %v673_v23 = vld [vmem:[#allocation7 + $0x18] sm:$0xff]   ;;  %v674_v24 = vld [vmem:[#allocation7 + $0x10] sm:$0xff]   ;;  %v676_v26 = vld [vmem:[#allocation7] sm:$0xff]  }
  0x3d   :  { %602 = vmatpush3.bf16.msra.mxu1 %v670_v16  ;;  %v677_v27 = vld [vmem:[#allocation8 + $0x38] sm:$0xff]   ;;  %v678_v28 = vld [vmem:[#allocation8 + $0x30] sm:$0xff]   ;;  %v679_v29 = vld [vmem:[#allocation8 + $0x28] sm:$0xff]  }
  0x3e   :  { %564 = vmatpush3.bf16.msra.mxu0 %v655_v6  ;;  %603 = vmatprep.subr.bf16.mxu1 %v801_v0  ;;  %v680_v30 = vld [vmem:[#allocation8 + $0x20] sm:$0xff]   ;;  %v681_v31 = vld [vmem:[#allocation8 + $0x18] sm:$0xff]   ;;  %v522_v35 = vld [vmem:[%s903_s2] ss:$0 sm:$0xff] }
  0x3f   :  { %565 = vmatprep.subr.bf16.mxu0 %v656_v7  ;;  %v682_v44 = vld [vmem:[#allocation8 + $0x10] sm:$0xff]   ;;  %v683_v45 = vld [vmem:[#allocation8 + $0x8] sm:$0xff]   ;;  %v684_v46 = vld [vmem:[#allocation8] sm:$0xff]  }
  0x40   :  { %v541_v47 = vld [vmem:[%s905_s4] ss:$0 sm:$0xff]  ;;  %s765_s4 = scalar_lea.vmem %s509_s27, 256 }
  0x41   :  { %604 = vmatpush3.bf16.msra.mxu1 %v671_v19  ;;  %v550_v57 = vld [vmem:[%s907_s6] ss:$0 sm:$0xff]  ;;  %p766_p6 = scmp.ne.s32.totalorder %s509_s27, %s765_s4  ;;  %p771_p8 = scmp.lt.s32.totalorder %s765_s4, %s765_s4 }
  0x42   :  { %566 = vmatpush3.bf16.msra.mxu0 %v657_v8  ;;  %605 = vmatprep.subr.bf16.mxu1 %v801_v0 }
  0x43   :  { %567 = vmatprep.subr.bf16.mxu0 %v658_v9  ;;  %p772_p9 = por %p771_p8, %p770_p7 }
  0x45   :  { %606 = vmatpush3.bf16.msra.mxu1 %v672_v21  ;;  %p773_p10 = pnand %p772_p9, %p766_p6 }
  0x46   :  { %568 = vmatpush3.bf16.msra.mxu0 %v659_v10  ;;  %607 = vmatprep.subr.bf16.mxu1 %v801_v0 }
  0x47   :  { %569 = vmatprep.subr.bf16.mxu0 %v660_v11 }
  0x49   :  { %608 = vmatpush3.bf16.msra.mxu1 %v673_v23 }
  0x4a   :  { %570 = vmatpush3.bf16.msra.mxu0 %v661_v12  ;;  %609 = vmatprep.subr.bf16.mxu1 %v801_v0 }
  0x4b   :  { %571 = vmatprep.subr.bf16.mxu0 %v662_v15 }
  0x4d   :  { %610 = vmatpush3.bf16.msra.mxu1 %v674_v24 }
  0x4e   :  { %572 = vmatpush3.bf16.msra.mxu0 %v663_v17  ;;  %611 = vmatprep.subr.bf16.mxu1 %v801_v0 }
  0x4f   :  { %573 = vmatprep.subr.bf16.mxu0 %v664_v18 }
  0x51   :  { %612 = vmatpush3.bf16.msra.mxu1 %v675_v25 }
  0x52   :  { %574 = vmatpush3.bf16.msra.mxu0 %v665_v20  ;;  %613 = vmatprep.subr.bf16.mxu1 %v801_v0 }
  0x53   :  { %619 = vmatprep.subr.bf16.mxu0 %v801_v0 }
  0x55   :  { %263 = vmatmul.mubr.bf16.vlgmr.msra.gmra.mxu0 %v666_v22  ;;  %614 = vmatpush3.bf16.msra.mxu1 %v676_v26 }
  0x56   :  { %635 = vmatprep.mubr.msk.bf16.mxu0 %vm802_vm0, %v801_v0  ;;  %620 = vmatpush3.bf16.msra.mxu0 %v677_v27 }
  0x57   :  { %621 = vmatprep.subr.bf16.mxu0 %v801_v0 }
  0x5a   :  { %622 = vmatpush3.bf16.msra.mxu0 %v678_v28 }
  0x5b   :  { %623 = vmatprep.subr.bf16.mxu0 %v801_v0 }
  0x5e   :  { %624 = vmatpush3.bf16.msra.mxu0 %v679_v29 }
  0x5f   :  { %625 = vmatprep.subr.bf16.mxu0 %v801_v0 }
  0x62   :  { %626 = vmatpush3.bf16.msra.mxu0 %v680_v30 }
  0x63   :  { %627 = vmatprep.subr.bf16.mxu0 %v801_v0 }
  0x66   :  { %628 = vmatpush3.bf16.msra.mxu0 %v681_v31 }
  0x67   :  { %629 = vmatprep.subr.bf16.mxu0 %v801_v0 }
  0x6a   :  { %630 = vmatpush3.bf16.msra.mxu0 %v682_v44 }
  0x6b   :  { %631 = vmatprep.subr.bf16.mxu0 %v801_v0 }
  0x6e   :  { %632 = vmatpush3.bf16.msra.mxu0 %v683_v45 }
  0x6f   :  { %633 = vmatprep.subr.bf16.mxu0 %v801_v0 }
  0x72   :  { %634 = vmatpush3.bf16.msra.mxu0 %v684_v46 }
 0x115   :  { %v575_v32 = vpop.f32.mrf.mxu0 }
 0x117   :  { %v576_v33 = vpop.f32.mrf.mxu0 }
 0x118   :  { %v577_v34 = vadd.f32 %v576_v33, %v575_v32 }
 0x119   :  { %v578_v36 = vpop.f32.mrf.mxu0 }
 0x11a   :  { %v265_v38 = vadd.f32 %v577_v34, %v522_v35 }
 0x11b   :  { %v579_v37 = vpop.f32.mrf.mxu0 }
 0x11c   :  { %v580_v39 = vadd.f32 %v579_v37, %v578_v36  ;;  %v271_v41 = vmax.f32 %v265_v38, 0.0 }
 0x11e   :  { %v268_v40 = vadd.f32 %v580_v39, %v522_v35 }
 0x120   :  { %v272_v42 = vmax.f32 %v268_v40, 0.0 }
 0x122   :  { %v273_v43 = vpack.c.bf16 %v272_v42, %v271_v41 }
 0x124   :  { %616 = vmatmul.mubr.bf16.vlgmr.msra.gmra.mxu1 %v273_v43 }
 0x1e4   :  { %v379_v48 = vpop.f32.mrf.mxu1 }
 0x1e5   :  { %v380_v50 = vadd.f32 %v541_v47, %v379_v48 }
 0x1e6   :  { %v617_v49 = vpop.f32.mrf.mxu1 }
 0x1e7   :  { %v386_v54 = vmax.f32 %v380_v50, 0.0 }
 0x1e8   :  { %v382_v51 = vpop.f32.mrf.mxu1 }
 0x1e9   :  { %v383_v52 = vadd.f32 %v541_v47, %v382_v51 }
 0x1ea   :  { %v618_v53 = vpop.f32.mrf.mxu1 }
 0x1eb   :  { %v387_v55 = vmax.f32 %v383_v52, 0.0 }
 0x1ed   :  { %v388_v56 = vpack.c.bf16 %v387_v55, %v386_v54 }
 0x1ef   :  { %636 = vmatmul.mubr.bf16.vlgmr.msra.gmra.mxu0 %v388_v56 }
 0x2af   :  { %v494_v58 = vpop.f32.mrf.mxu0 }
 0x2b0   :  { %v495_v59 = vadd.f32 %v550_v57, %v494_v58 }
 0x2b1   :  { %v637_v60 = vpop.f32.mrf.mxu0 }
 0x2b2   :  { %501 = vst [vmem:[#allocation10] sm:$0xff] %v495_v59 }
 0x2b3   :  { %v497_v61 = vpop.f32.mrf.mxu0 }
 0x2b4   :  { %v498_v62 = vadd.f32 %v550_v57, %v497_v61 }
 0x2b5   :  { %v638_v63 = vpop.f32.mrf.mxu0 }
 0x2b6   :  { %502 = vst [vmem:[#allocation10 + $0x8] sm:$0xff] %v498_v62 }
 0x2b7   :  { %776 = shalt.err (!%p773_p10)
}
 0x2b8   :  { %514 = dma.vmem_to_hbm [thread:$0]  %s509_s27, 256, %s908_s7, [#allocation4], %s797_s11, %s797_s11, %s798_s12  }
 0x2b9   :  { %791 = dma.done.wait [#allocation4], 256  }
 0x2ba   :  { %792 = vsyncadd [#allocation4], 4294967040 }
 0x2bb   :  { %518 = vsyncpa [#allocation3], 1 }
 0x2bc   :  { %519 = vsyncpa [#allocation6], 1 }
 0x2bd   :  { %520 = vsyncpa [#allocation9], 1 }
 0x2be   :  { %521 = vsyncpa [#allocation4], 1 }

</bundles_post_ra>
